<compile_context>
chip_gen: v7x
topology: tpu7x:2x2x1
jax: 0.10.0
libtpu: 0.0.40
codegen_flags: <defaults>
</compile_context>

<pallas_src>
import jax
import jax.numpy as jnp
import numpy as np
from jax.experimental import pallas as pl
from jax.experimental.pallas import tpu as pltpu


def _round_up(v, m):
    return ((v + m - 1) // m) * m


def _make_mlp_kernel(num_hidden_layers):
    """Fused [Linear+ReLU]*num_hidden_layers -> Linear(., 1) kernel body."""

    def kernel(*refs):
        # refs = (x_ref, w0, b0, ..., w_{L-1}, b_{L-1}, w_head, b_head, o_ref)
        x_ref = refs[0]
        o_ref = refs[-1]
        wb = refs[1:-1]

        h = x_ref[...]                              # (tile, state_dim)
        for l in range(num_hidden_layers):
            w = wb[2 * l][...]                      # (din, dout)  MXU dtype
            b = wb[2 * l + 1][...]                  # (1, dout)    float32
            if h.dtype != w.dtype:                  # in-kernel cast (VPU, free)
                h = h.astype(w.dtype)
            h = jnp.maximum(
                jnp.dot(h, w, preferred_element_type=jnp.float32) + b, 0.0)

        # Head (out_features == 1): VPU multiply + XLU lane-reduce, skip MXU.
        w_head = wb[-2][...]                        # (1, hidden_last) float32
        b_head = wb[-1][...]                        # (1, 1)           float32
        o_ref[...] = jnp.sum(h * w_head, axis=-1, keepdims=True) + b_head

    return kernel


def _choose_batch_tile(batch, max_batch_tile):
    """Single grid step for small batches; >=2 steps (v7x dual-TC) for large."""
    if batch <= max_batch_tile // 2:
        return batch                                # block == full batch dim
    half = -(-batch // 2)                           # ceil(B / 2)
    return min(max_batch_tile, _round_up(half, 8))  # multiple of 8 sublanes


def ppo_value_net_forward(x, params, *, mxu_dtype=None, max_batch_tile=1024):
    """PPOValueNet forward as one fused Pallas kernel.

    x:       (B, state_dim)
    params:  list of (W, b); hidden W: (in, out), b: (1, out); last pair is the
             head with W: (hidden_last, 1), b: (1, 1).
    Returns  (B, 1) float32.
    """
    batch, state_dim = x.shape
    num_hidden = len(params) - 1
    if mxu_dtype is None:
        mxu_dtype = x.dtype                         # dots in the input dtype

    tile = _choose_batch_tile(batch, max_batch_tile)
    grid = pl.cdiv(batch, tile)                     # partial edge block is clamped

    # Whole-array VMEM residents for all constants (loaded once, no per-step
    # re-DMA, no double-buffering of constants).
    const_spec = pl.BlockSpec(memory_space=pltpu.MemorySpace.VMEM)

    in_specs = [pl.BlockSpec((tile, state_dim), lambda i: (i, 0))]
    flat = []
    for (w, b) in params[:-1]:
        flat.append(jnp.asarray(w).astype(mxu_dtype))
        in_specs.append(const_spec)
        flat.append(jnp.asarray(b).reshape(1, -1).astype(jnp.float32))
        in_specs.append(const_spec)
    w_head, b_head = params[-1]
    flat.append(jnp.asarray(w_head).reshape(1, -1).astype(jnp.float32))
    in_specs.append(const_spec)
    flat.append(jnp.asarray(b_head).reshape(1, 1).astype(jnp.float32))
    in_specs.append(const_spec)

    # Advisory cost hint for XLA's scheduler around the custom call.
    dims = [state_dim] + [w.shape[1] for (w, _) in params[:-1]]
    flops = sum(2 * batch * a * b for a, b in zip(dims[:-1], dims[1:]))
    flops += 2 * batch * dims[-1]                   # scalar head
    bytes_accessed = (int(x.size) * x.dtype.itemsize
                      + sum(int(a.size) * a.dtype.itemsize for a in flat)
                      + batch * 4)

    out = pl.pallas_call(
        _make_mlp_kernel(num_hidden),
        out_shape=jax.ShapeDtypeStruct((batch, 1), jnp.float32),
        grid=(grid,),
        in_specs=in_specs,
        out_specs=pl.BlockSpec((tile, 1), lambda i: (i, 0)),
        compiler_params=pltpu.CompilerParams(
            dimension_semantics=("parallel",)),
        cost_estimate=pl.CostEstimate(flops=int(flops), transcendentals=0,
                                      bytes_accessed=int(bytes_accessed)),
    )(x, *flat)
    return out


def init_ppo_value_net_params(key, state_dim, hidden_layers_dim):
    """Mimic PyTorch nn.Linear default init: U(-1/sqrt(fan_in), 1/sqrt(fan_in))."""
    params = []
    dims = [state_dim] + list(hidden_layers_dim)
    for din, dout in zip(dims[:-1], dims[1:]):
        key, kw, kb = jax.random.split(key, 3)
        bound = 1.0 / np.sqrt(din)
        w = jax.random.uniform(kw, (din, dout), jnp.float32, -bound, bound)
        b = jax.random.uniform(kb, (1, dout), jnp.float32, -bound, bound)
        params.append((w, b))
    din = dims[-1]
    key, kw, kb = jax.random.split(key, 3)
    bound = 1.0 / np.sqrt(din)
    w = jax.random.uniform(kw, (din, 1), jnp.float32, -bound, bound)
    b = jax.random.uniform(kb, (1, 1), jnp.float32, -bound, bound)
    params.append((w, b))
    return params


def ppo_value_net_reference(x, params):
    """Pure-JAX reference of the PyTorch forward pass."""
    h = x
    for (w, b) in params[:-1]:
        h = jnp.maximum(h @ w + b, 0.0)
    w, b = params[-1]
    return h @ w + b


if __name__ == "__main__":
    key = jax.random.PRNGKey(0)

    # Small shapes consistent with the module: batch=16, state_dim=16,
    # hidden_layers_dim=[32, 32] -> output (16, 1).
    batch, state_dim, hidden_layers_dim = 16, 16, [32, 32]

    key, kx, kp, kx2 = jax.random.split(key, 4)
    x = jax.random.normal(kx, (batch, state_dim), dtype=jnp.float32)
    params = init_ppo_value_net_params(kp, state_dim, hidden_layers_dim)
    ref = ppo_value_net_reference(x, params)

    # f32 path: single grid step (whole batch in one tile).
    out = jax.block_until_ready(ppo_value_net_forward(x, params))
    np.testing.assert_allclose(np.asarray(out), np.asarray(ref),
                               rtol=1e-5, atol=1e-5)
    assert out.shape == (batch, 1)

    # bf16 MXU path: x stays f32 in HBM, cast to bf16 inside the kernel (VPU);
    # f32 accumulation, f32 bias/ReLU/head math.
    out_bf16 = jax.block_until_ready(
        ppo_value_net_forward(x, params, mxu_dtype=jnp.bfloat16))
    np.testing.assert_allclose(np.asarray(out_bf16), np.asarray(ref),
                               rtol=5e-2, atol=5e-2)

    # Ragged big batch: 2 "parallel" grid steps (v7x dual-TC), partial edge
    # block handled by Pallas clamping -- no wrapper-side pad/slice passes.
    x2 = jax.random.normal(kx2, (1030, state_dim), dtype=jnp.float32)
    out2 = jax.block_until_ready(ppo_value_net_forward(x2, params))
    ref2 = ppo_value_net_reference(x2, params)
    np.testing.assert_allclose(np.asarray(out2), np.asarray(ref2),
                               rtol=1e-5, atol=1e-5)
    assert out2.shape == (1030, 1)

    print("KERNEL_OK")
</pallas_src>

<mosaic_0001>
module attributes {stable_mosaic.version = 11 : i64} {
  func.func @kernel(%arg0: i32, %arg1: memref<16x16xf32, #tpu.memory_space<vmem>>, %arg2: memref<16x32xf32, #tpu.memory_space<vmem>>, %arg3: memref<1x32xf32, #tpu.memory_space<vmem>>, %arg4: memref<32x32xf32, #tpu.memory_space<vmem>>, %arg5: memref<1x32xf32, #tpu.memory_space<vmem>>, %arg6: memref<1x32xf32, #tpu.memory_space<vmem>>, %arg7: memref<1x1xf32, #tpu.memory_space<vmem>>, %arg8: memref<16x1xf32, #tpu.memory_space<vmem>>) attributes {dimension_semantics = [#tpu.dimension_semantics<parallel>], iteration_bounds = array<i64: 1>, scalar_prefetch = 0 : i64, scratch_operands = 0 : i64, tpu.core_type = #tpu.core_type<tc>, window_params = [{transform_indices = @transform_0, window_bounds = array<i64: 16, 16>}, {pipeline_mode = #tpu.pipeline_mode<synchronous>, transform_indices = @transform_1, window_bounds = array<i64: 16, 32>}, {pipeline_mode = #tpu.pipeline_mode<synchronous>, transform_indices = @transform_2, window_bounds = array<i64: 1, 32>}, {pipeline_mode = #tpu.pipeline_mode<synchronous>, transform_indices = @transform_3, window_bounds = array<i64: 32, 32>}, {pipeline_mode = #tpu.pipeline_mode<synchronous>, transform_indices = @transform_4, window_bounds = array<i64: 1, 32>}, {pipeline_mode = #tpu.pipeline_mode<synchronous>, transform_indices = @transform_5, window_bounds = array<i64: 1, 32>}, {pipeline_mode = #tpu.pipeline_mode<synchronous>, transform_indices = @transform_6, window_bounds = array<i64: 1, 1>}, {transform_indices = @transform_7, window_bounds = array<i64: 16, 1>}]} {
    %c0 = arith.constant 0 : index
    %c0_0 = arith.constant 0 : index
    %0 = vector.load %arg1[%c0, %c0_0] : memref<16x16xf32, #tpu.memory_space<vmem>>, vector<16x16xf32>
    %c0_1 = arith.constant 0 : index
    %c0_2 = arith.constant 0 : index
    %1 = vector.load %arg2[%c0_1, %c0_2] : memref<16x32xf32, #tpu.memory_space<vmem>>, vector<16x32xf32>
    %c0_3 = arith.constant 0 : index
    %c0_4 = arith.constant 0 : index
    %2 = vector.load %arg3[%c0_3, %c0_4] : memref<1x32xf32, #tpu.memory_space<vmem>>, vector<1x32xf32>
    %cst = arith.constant dense<0.000000e+00> : vector<16x32xf32>
    %3 = tpu.matmul %0, %1, %cst {dimension_numbers = #tpu.dot_dimension_numbers<[1], [0], [0], [1], [0, 0, 1, 1], [], []>} : vector<16x16xf32>, vector<16x32xf32>, vector<16x32xf32> -> vector<16x32xf32>
    %4 = vector.broadcast %2 : vector<1x32xf32> to vector<16x32xf32>
    %5 = arith.addf %3, %4 : vector<16x32xf32>
    %cst_5 = arith.constant 0.000000e+00 : f32
    %6 = vector.broadcast %cst_5 : f32 to vector<16x32xf32>
    %7 = arith.maximumf %5, %6 : vector<16x32xf32>
    %c0_6 = arith.constant 0 : index
    %c0_7 = arith.constant 0 : index
    %8 = vector.load %arg4[%c0_6, %c0_7] : memref<32x32xf32, #tpu.memory_space<vmem>>, vector<32x32xf32>
    %c0_8 = arith.constant 0 : index
    %c0_9 = arith.constant 0 : index
    %9 = vector.load %arg5[%c0_8, %c0_9] : memref<1x32xf32, #tpu.memory_space<vmem>>, vector<1x32xf32>
    %cst_10 = arith.constant dense<0.000000e+00> : vector<16x32xf32>
    %10 = tpu.matmul %7, %8, %cst_10 {dimension_numbers = #tpu.dot_dimension_numbers<[1], [0], [0], [1], [0, 0, 1, 1], [], []>} : vector<16x32xf32>, vector<32x32xf32>, vector<16x32xf32> -> vector<16x32xf32>
    %11 = vector.broadcast %9 : vector<1x32xf32> to vector<16x32xf32>
    %12 = arith.addf %10, %11 : vector<16x32xf32>
    %cst_11 = arith.constant 0.000000e+00 : f32
    %13 = vector.broadcast %cst_11 : f32 to vector<16x32xf32>
    %14 = arith.maximumf %12, %13 : vector<16x32xf32>
    %c0_12 = arith.constant 0 : index
    %c0_13 = arith.constant 0 : index
    %15 = vector.load %arg6[%c0_12, %c0_13] : memref<1x32xf32, #tpu.memory_space<vmem>>, vector<1x32xf32>
    %c0_14 = arith.constant 0 : index
    %c0_15 = arith.constant 0 : index
    %16 = vector.load %arg7[%c0_14, %c0_15] : memref<1x1xf32, #tpu.memory_space<vmem>>, vector<1x1xf32>
    %17 = vector.broadcast %15 : vector<1x32xf32> to vector<16x32xf32>
    %18 = arith.mulf %14, %17 : vector<16x32xf32>
    %cst_16 = arith.constant dense<0.000000e+00> : vector<16xf32>
    %19 = vector.multi_reduction <add>, %18, %cst_16 [1] : vector<16x32xf32> to vector<16xf32>
    %20 = vector.shape_cast %19 : vector<16xf32> to vector<16x1xf32>
    %21 = vector.broadcast %16 : vector<1x1xf32> to vector<16x1xf32>
    %22 = arith.addf %20, %21 : vector<16x1xf32>
    %c0_17 = arith.constant 0 : index
    %c0_18 = arith.constant 0 : index
    %23 = vector.load %arg8[%c0_17, %c0_18] : memref<16x1xf32, #tpu.memory_space<vmem>>, vector<16x1xf32>
    tpu.vector_store %arg8[%c0_17, %c0_18], %22 {strides = array<i32>} : memref<16x1xf32, #tpu.memory_space<vmem>>, vector<16x1xf32>,
    return
  }
  func.func @transform_0(%arg0: i32) -> (i32, i32) {
    %c0_i32 = arith.constant 0 : i32
    %c0_i32_0 = arith.constant 0 : i32
    return %arg0, %c0_i32 : i32, i32
  }
  func.func @transform_1(%arg0: i32) -> (i32, i32) {
    %c0_i32 = arith.constant 0 : i32
    %c0_i32_0 = arith.constant 0 : i32
    %c0_i32_1 = arith.constant 0 : i32
    return %c0_i32, %c0_i32_0 : i32, i32
  }
  func.func @transform_2(%arg0: i32) -> (i32, i32) {
    %c0_i32 = arith.constant 0 : i32
    %c0_i32_0 = arith.constant 0 : i32
    %c0_i32_1 = arith.constant 0 : i32
    return %c0_i32, %c0_i32_0 : i32, i32
  }
  func.func @transform_3(%arg0: i32) -> (i32, i32) {
    %c0_i32 = arith.constant 0 : i32
    %c0_i32_0 = arith.constant 0 : i32
    %c0_i32_1 = arith.constant 0 : i32
    return %c0_i32, %c0_i32_0 : i32, i32
  }
  func.func @transform_4(%arg0: i32) -> (i32, i32) {
    %c0_i32 = arith.constant 0 : i32
    %c0_i32_0 = arith.constant 0 : i32
    %c0_i32_1 = arith.constant 0 : i32
    return %c0_i32, %c0_i32_0 : i32, i32
  }
  func.func @transform_5(%arg0: i32) -> (i32, i32) {
    %c0_i32 = arith.constant 0 : i32
    %c0_i32_0 = arith.constant 0 : i32
    %c0_i32_1 = arith.constant 0 : i32
    return %c0_i32, %c0_i32_0 : i32, i32
  }
  func.func @transform_6(%arg0: i32) -> (i32, i32) {
    %c0_i32 = arith.constant 0 : i32
    %c0_i32_0 = arith.constant 0 : i32
    %c0_i32_1 = arith.constant 0 : i32
    return %c0_i32, %c0_i32_0 : i32, i32
  }
  func.func @transform_7(%arg0: i32) -> (i32, i32) {
    %c0_i32 = arith.constant 0 : i32
    %c0_i32_0 = arith.constant 0 : i32
    return %arg0, %c0_i32 : i32, i32
  }
}

</mosaic_0001>

<bundles_post_ra>
// kernel: tpu_custom_call.1
= control target key start
LH: loop header
LB: loop body
LE: loop exit
PB: predicated region body
PF: predicated region fallthrough
CT: control target
= control target key end

     0   :  { %s534_s0 = inlined_call_operand.hbm [shape: f32[16,16], index: 0, kind: input, shape index: {}]   ;;  %s535_s1 = inlined_call_operand.hbm [shape: f32[16,32], index: 1, kind: input, shape index: {}]   ;;  %s536_s2 = inlined_call_operand.vmem [shape: f32[1,32], index: 2, kind: input, shape index: {}]   ;;  %s537_s3 = inlined_call_operand.hbm [shape: f32[32,32], index: 3, kind: input, shape index: {}]   ;;  %s538_s4 = inlined_call_operand.vmem [shape: f32[1,32], index: 4, kind: input, shape index: {}]   ;;  %s539_s5 = inlined_call_operand.vmem [shape: f32[1,32], index: 5, kind: input, shape index: {}]   ;;  %s540_s6 = inlined_call_operand.<no memory space> [shape: f32[1,1], index: 6, kind: input, shape index: {}]   ;;  %s541_s7 = inlined_call_operand.vmem [shape: f32[16,1], index: 7, kind: output, shape index: {}]  }
   0x1   :  { %v12_v0 = vstv %s540_s6 }
   0x2   :  { %13 = vst [vmem:[#allocation2] sm:$0x1] %v12_v0 }
   0x3   :  { %14 = vsyncpa [#allocation4], 0 }
   0x4   :  { %15 = vsyncpa [#allocation6], 0  ;;  %s415_s26 = smov [#allocation5]   ;;  %s416_s28 = smov [#allocation3]  }
   0x5   :  { %s33_s27 = sshll.u32 %s415_s26, 4  ;;  %s21_s29 = sshll.u32 %s416_s28, 4  ;;  %s34_s27 = int_to_ptr.vmem [resolvable:$true] %s33_s27  ;;  %s463_s29 = int_to_ptr.vmem [resolvable:$true] %s21_s29 }
   0x6   :  { %s345_s9 = scalar_lea.hbm %s535_s1, 256 }
   0x7   :  { %p346_p0 = scmp.ne.s32.totalorder %s535_s1, %s345_s9  ;;  %p349_p1 = scmp.lt.u32.totalorder %s345_s9, %s535_s1 }
   0x9   :  { %p351_p2 = pnand %p349_p1, %p346_p0 }
   0xb   :  { %354 = shalt.err (!%p351_p2)
}
   0xc   :  { %s355_s13 = scalar_lea.vmem %s34_s27, 256  ;;  %p360_p4 = scmp.lt.s32.totalorder %s34_s27, %s34_s27 }
   0xd   :  { %p356_p3 = scmp.ne.s32.totalorder %s34_s27, %s355_s13  ;;  %p361_p5 = scmp.lt.s32.totalorder %s355_s13, %s355_s13 }
   0xf   :  { %p362_p6 = por %p361_p5, %p360_p4 }
  0x11   :  { %p363_p7 = pnand %p362_p6, %p356_p3 }
  0x13   :  { %366 = shalt.err (!%p363_p7)
}
  0x14   :  { %s417_s14 = smov 128   ;;  %s418_s15 = smov 8  }
  0x15   :  { %39 = dma.hbm_to_vmem [thread:$0]  %s535_s1, 256, %s34_s27, [#allocation6], %s417_s14, %s417_s14, %s418_s15  }
  0x16   :  { %s367_s20 = scalar_lea.hbm %s534_s0, 256 }
  0x17   :  { %p368_p8 = scmp.ne.s32.totalorder %s534_s0, %s367_s20  ;;  %p371_p9 = scmp.lt.u32.totalorder %s367_s20, %s534_s0 }
  0x19   :  { %p373_p10 = pnand %p371_p9, %p368_p8 }
  0x1b   :  { %376 = shalt.err (!%p373_p10)
}
  0x1c   :  { %s377_s25 = scalar_lea.vmem %s463_s29, 256  ;;  %p382_p12 = scmp.lt.s32.totalorder %s463_s29, %s463_s29 }
  0x1d   :  { %p378_p11 = scmp.ne.s32.totalorder %s463_s29, %s377_s25  ;;  %p383_p13 = scmp.lt.s32.totalorder %s377_s25, %s377_s25 }
  0x1f   :  { %p384_p0 = por %p383_p13, %p382_p12 }
  0x21   :  { %p385_p1 = pnand %p384_p0, %p378_p11 }
  0x23   :  { %388 = shalt.err (!%p385_p1)
}
  0x24   :  { %27 = dma.hbm_to_vmem [thread:$0]  %s534_s0, 256, %s463_s29, [#allocation4], %s417_s14, %s417_s14, %s418_s15  }
  0x25   :  { %s419_s27 = smov [#allocation7]   ;;  %s389_s9 = scalar_lea.hbm %s537_s3, 512 }
  0x26   :  { %s47_s28 = sshll.u32 %s419_s27, 4  ;;  %p390_p2 = scmp.ne.s32.totalorder %s537_s3, %s389_s9  ;;  %s48_s28 = int_to_ptr.vmem [resolvable:$true] %s47_s28 }
  0x27   :  { %p393_p3 = scmp.lt.u32.totalorder %s389_s9, %s537_s3 }
  0x29   :  { %p395_p4 = pnand %p393_p3, %p390_p2 }
  0x2b   :  { %398 = shalt.err (!%p395_p4)
}
  0x2c   :  { %s399_s13 = scalar_lea.vmem %s48_s28, 512  ;;  %p404_p6 = scmp.lt.s32.totalorder %s48_s28, %s48_s28 }
  0x2d   :  { %p400_p5 = scmp.ne.s32.totalorder %s48_s28, %s399_s13  ;;  %p405_p7 = scmp.lt.s32.totalorder %s399_s13, %s399_s13 }
  0x2f   :  { %p406_p8 = por %p405_p7, %p404_p6 }
  0x31   :  { %p407_p9 = pnand %p406_p8, %p400_p5 }
  0x33   :  { %410 = shalt.err (!%p407_p9)
}
  0x34   :  { %53 = dma.hbm_to_vmem [thread:$0]  %s537_s3, 512, %s48_s28, [#allocation6], %s417_s14, %s417_s14, %s418_s15  }
  0x35   :  { %411 = dma.done.wait [#allocation4], 256  }
  0x36   :  { %412 = vsyncadd [#allocation4], 4294967040 }
  0x37   :  { %413 = dma.done.wait [#allocation6], 768  }
  0x38   :  { %414 = vsyncadd [#allocation6], 4294966528  ;;  %vm80_vm0 = vcmask 130048   ;;  %v71_v1 = vld [vmem:[#allocation5] sm:$0xff]  ;;  %v72_v2 = vld [vmem:[#allocation5 + $0x8] sm:$0xff]  ;;  %vm175_vm1 = vcmask 261120  }
  0x39   :  { %v69_v3 = vld [vmem:[#allocation3] sm:$0xff]  ;;  %v328_v4 = vpack.c.bf16 %v72_v2, %v71_v1  ;;  %v165_v6 = vld [vmem:[#allocation7 + $0x8] sm:$0xff]  ;;  %v166_v9 = vld [vmem:[#allocation7 + $0x10] sm:$0xff]  ;;  %vm283_vm2 = vcmask 7168  }
  0x3a   :  { %314 = vmatprep.mubr.msk.f32.mxu0 %vm80_vm0, %v69_v3  ;;  %v164_v5 = vld [vmem:[#allocation7] sm:$0xff]  ;;  %v70_v8 = vld [vmem:[#allocation3 + $0x8] sm:$0xff]  ;;  %v167_v10 = vld [vmem:[#allocation7 + $0x18] sm:$0xff] }
  0x3b   :  { %v332_v7 = vpack.c.bf16 %v165_v6, %v164_v5  ;;  %329 = vmatprep.subr.bf16.mxu0 %v328_v4  ;;  %v336_v11 = vpack.c.bf16 %v167_v10, %v166_v9  ;;  %v292_v12 = vld [vmem:[%s536_s2] ss:$0 sm:$0xff] }
  0x3c   :  { %331 = vmatpush3.bf16.msra.mxu0 %v328_v4  ;;  %v295_v19 = vld [vmem:[%s538_s4] ss:$0 sm:$0xff] }
  0x3d   :  { %333 = vmatprep.subr.bf16.mxu1 %v332_v7  ;;  %v298_v24 = vld [vmem:[%s539_s5] ss:$0 sm:$0xff] }
  0x3e   :  { %335 = vmatpush3.bf16.msra.mxu1 %v332_v7  ;;  %v299_v31 = vld [vmem:[#allocation2] ss:$0 sm:$0xff] }
  0x3f   :  { %315 = vmatmul.mubr.msk.f32.vlgmr.msra.gmra.mrb[0].mxu0 %vm80_vm0, %v70_v8  ;;  %337 = vmatprep.subr.bf16.mxu1 %v336_v11 }
  0x42   :  { %339 = vmatpush3.bf16.msra.mxu1 %v336_v11 }
 0x112   :  { %v316_v13 = vpop.f32.mrb[0].mxu0 }
 0x113   :  { %v159_v14 = vadd.f32 %v316_v13, %v292_v12  ;;  %v153_v15 = vpop.f32.mrb[1].mxu0 }
 0x114   :  { %v154_v16 = vadd.f32 %v292_v12, %v153_v15 }
 0x115   :  { %v163_v18 = vmax.f32 %v159_v14, 0.0 }
 0x116   :  { %v162_v17 = vmax.f32 %v154_v16, 0.0 }
 0x118   :  { %325 = vmatprep.mubr.msk.f32.mxu1 %vm175_vm1, %v162_v17 }
 0x119   :  { %326 = vmatmul.mubr.msk.f32.vlgmr.msra.gmra.mrb[0].mxu1 %vm175_vm1, %v163_v18 }
 0x1ec   :  { %v327_v20 = vpop.f32.mrb[0].mxu1 }
 0x1ed   :  { %v254_v21 = vadd.f32 %v327_v20, %v295_v19  ;;  %v248_v22 = vpop.f32.mrb[1].mxu1 }
 0x1ee   :  { %v249_v23 = vadd.f32 %v295_v19, %v248_v22 }
 0x1ef   :  { %v258_v25 = vmax.f32 %v254_v21, 0.0 }
 0x1f0   :  { %v257_v26 = vmax.f32 %v249_v23, 0.0 }
 0x1f1   :  { %v268_v29 = vmul.f32 %v298_v24, %v258_v25 }
 0x1f2   :  { %v267_v27 = vmul.f32 %v298_v24, %v257_v26 }
 0x1f3   :  { %v272_v30 = vsel %vm175_vm1, %v268_v29, 0.0 }
 0x1f4   :  { %v269_v28 = vsel %vm175_vm1, %v267_v27, 0.0 }
 0x1f5   :  { %270 = vadd.xlane.f32.xlu0 %v269_v28 }
 0x1f9   :  { %273 = vadd.xlane.f32.xlu0 %v272_v30 }
 0x282   :  { %v271_v32 = vpop.xlane.xlu0 %270 }
 0x283   :  { %v281_v33 = vadd.f32 %v299_v31, %v271_v32 }
 0x285   :  { %284 = vst.msk [vmem:[%s541_s7] sm:$0xff] %vm283_vm2, %v281_v33 }
 0x286   :  { %v274_v34 = vpop.xlane.xlu0 %273 }
 0x287   :  { %v282_v35 = vadd.f32 %v299_v31, %v274_v34 }
 0x289   :  { %285 = vst.msk [vmem:[%s541_s7 + $0x8] sm:$0xff] %vm283_vm2, %v282_v35 }
 0x28a   :  { %290 = vsyncpa [#allocation4], 1 }
 0x28b   :  { %291 = vsyncpa [#allocation6], 1 }

</bundles_post_ra>
